<compile_context>
chip_gen: v5e
topology: v5e:2x2
jax: 0.10.0
libtpu: 0.0.40
codegen_flags: <defaults>
</compile_context>

<pallas_src>
import functools
import math

import jax
import jax.numpy as jnp
import numpy as np
from jax.experimental import pallas as pl
from jax.experimental.pallas import tpu as pltpu

# eval-mode BatchNorm: running_mean=0, running_var=1, weight=1, bias=0 -> x/sqrt(1+eps)
BN_SCALE = 1.0 / math.sqrt(1.0 + 1e-5)
VMEM_LIMIT = 48 * 1024 * 1024   # < v7x 64 MiB physical VMEM, > v5e 16 MiB default scope


def rup(x, m):
    return (x + m - 1) // m * m


# ----------------------------------------------------------------------------
# Pallas kernel 1: tiled MXU matmul with fused (scale, bias, relu) epilogue.
# Used by every conv (via im2col) and the FC layers.
# ----------------------------------------------------------------------------
def _mm_kernel(a_ref, b_ref, c_ref, o_ref, acc_ref, *, scale, relu):
    @pl.when(pl.program_id(2) == 0)
    def _():
        acc_ref[...] = jnp.zeros_like(acc_ref)

    acc_ref[...] += jnp.dot(a_ref[...], b_ref[...],
                            preferred_element_type=jnp.float32)

    @pl.when(pl.program_id(2) == pl.num_programs(2) - 1)
    def _():
        y = acc_ref[...]
        if scale != 1.0:
            y = y * scale
        y = y + c_ref[...]
        if relu:
            y = jnp.maximum(y, 0.0)
        o_ref[...] = y


@functools.lru_cache(maxsize=None)
def _matmul_call(Mp, Kp, Np, tm, tn, tk, scale, relu):
    call = pl.pallas_call(
        functools.partial(_mm_kernel, scale=scale, relu=relu),
        out_shape=jax.ShapeDtypeStruct((Mp, Np), jnp.float32),
        grid=(Mp // tm, Np // tn, Kp // tk),
        in_specs=[
            pl.BlockSpec((tm, tk), lambda i, j, k: (i, k)),
            pl.BlockSpec((tk, tn), lambda i, j, k: (k, j)),
            pl.BlockSpec((1, tn), lambda i, j, k: (0, j)),
        ],
        out_specs=pl.BlockSpec((tm, tn), lambda i, j, k: (i, j)),
        scratch_shapes=[pltpu.VMEM((tm, tn), jnp.float32)],
        compiler_params=pltpu.CompilerParams(
            dimension_semantics=("parallel", "parallel", "arbitrary"),
            vmem_limit_bytes=VMEM_LIMIT),
    )
    return jax.jit(call)


def pallas_matmul(a, b, scale=1.0, bias=None, relu=False):
    """(M,K)@(K,N) in bf16 on the MXU with f32 accumulation; fused epilogue."""
    M, K = a.shape
    _, N = b.shape
    tm = min(256, rup(M, 8))
    tn = min(256, rup(N, 128))
    tk = min(512, rup(K, 128))
    Mp, Kp, Np = rup(M, tm), rup(K, tk), rup(N, tn)
    a_p = jnp.pad(a.astype(jnp.bfloat16), ((0, Mp - M), (0, Kp - K)))
    b_p = jnp.pad(b.astype(jnp.bfloat16), ((0, Kp - K), (0, Np - N)))
    if bias is None:
        c_vec = jnp.zeros((1, Np), jnp.float32)
    else:
        c_vec = jnp.pad(bias.astype(jnp.float32), (0, Np - N)).reshape(1, Np)
    fn = _matmul_call(Mp, Kp, Np, tm, tn, tk, float(scale), bool(relu))
    out = fn(a_p, b_p, c_vec)
    return out[:M, :N]


# ----------------------------------------------------------------------------
# Pallas kernel 2: fused attention (affinity matmul + softmax + context matmul)
# Tiled over (batch, Lq tiles, Dv tiles); softmax is computed once per Lq tile
# into a persistent VMEM scratch and reused across Dv tiles.
# ----------------------------------------------------------------------------
def _attn_kernel(q_ref, k_ref, v_ref, ctx_ref, aff_ref, p_scr, *, lk, scale):
    @pl.when(pl.program_id(2) == 0)
    def _():
        s = jnp.dot(q_ref[0], k_ref[0], preferred_element_type=jnp.float32) * scale
        mask = jax.lax.broadcasted_iota(jnp.int32, s.shape, 1) < lk
        s = jnp.where(mask, s, -1e30)
        m = jnp.max(s, axis=-1, keepdims=True)
        e = jnp.exp(s - m)
        p_scr[...] = e * pl.reciprocal(jnp.sum(e, axis=-1, keepdims=True),
                                       approx=True)

    ctx_ref[0] = jnp.dot(p_scr[...].astype(jnp.bfloat16), v_ref[0],
                         preferred_element_type=jnp.float32)

    @pl.when(pl.program_id(2) == pl.num_programs(2) - 1)
    def _():
        aff_ref[0] = p_scr[...]


@functools.lru_cache(maxsize=None)
def _attn_call(B, Lqp, Dkp, Lkp, Dvp, tLq, tDv, lk, scale):
    call = pl.pallas_call(
        functools.partial(_attn_kernel, lk=lk, scale=scale),
        out_shape=(jax.ShapeDtypeStruct((B, Lqp, Dvp), jnp.float32),
                   jax.ShapeDtypeStruct((B, Lqp, Lkp), jnp.float32)),
        grid=(B, Lqp // tLq, Dvp // tDv),
        in_specs=[
            pl.BlockSpec((1, tLq, Dkp), lambda b, i, j: (b, i, 0)),
            pl.BlockSpec((1, Dkp, Lkp), lambda b, i, j: (b, 0, 0)),
            pl.BlockSpec((1, Lkp, tDv), lambda b, i, j: (b, 0, j)),
        ],
        out_specs=(pl.BlockSpec((1, tLq, tDv), lambda b, i, j: (b, i, j)),
                   pl.BlockSpec((1, tLq, Lkp), lambda b, i, j: (b, i, 0))),
        scratch_shapes=[pltpu.VMEM((tLq, Lkp), jnp.float32)],
        compiler_params=pltpu.CompilerParams(
            dimension_semantics=("parallel", "parallel", "arbitrary"),
            vmem_limit_bytes=VMEM_LIMIT),
    )
    return jax.jit(call)


def pallas_attention(q, k, v, scale):
    """q: (B, Lq, Dk), k: (B, Dk, Lk), v: (B, Lk, Dv) -> (context, affinity)."""
    B, Lq, Dk = q.shape
    Lk = k.shape[2]
    Dv = v.shape[2]
    tLq = min(256, rup(Lq, 8))
    tDv = min(512, rup(Dv, 128))
    Lqp, Dkp, Lkp, Dvp = rup(Lq, tLq), rup(Dk, 128), rup(Lk, 128), rup(Dv, tDv)
    # zero-padding invariant: Dk padding must stay exactly zero so the QK dot is exact.
    qp = jnp.pad(q.astype(jnp.bfloat16), ((0, 0), (0, Lqp - Lq), (0, Dkp - Dk)))
    kp = jnp.pad(k.astype(jnp.bfloat16), ((0, 0), (0, Dkp - Dk), (0, Lkp - Lk)))
    vp = jnp.pad(v.astype(jnp.bfloat16), ((0, 0), (0, Lkp - Lk), (0, Dvp - Dv)))
    fn = _attn_call(B, Lqp, Dkp, Lkp, Dvp, tLq, tDv, int(Lk), float(scale))
    ctx, aff = fn(qp, kp, vp)
    return ctx[:, :Lq, :Dv], aff[:, :Lq, :Lk]


# ----------------------------------------------------------------------------
# Pallas kernel 3: group-wise correlation cost volume.
# Target features are left-padded once (no maxdisp-times materialized copies);
# the disparity shift is a static in-kernel slice of the resident VMEM block
# and the per-group mean is a cheap VPU reduction (no MXU).
# ----------------------------------------------------------------------------
def _gwc_kernel(ref_ref, tgt_ref, out_ref, *, G, cpg, Dm, W):
    ref = ref_ref[0]                                     # (C, tH, W) f32
    tgt_full = tgt_ref[0]                                # (C, tH, W + Dm - 1)
    tH = ref.shape[1]
    for d in range(Dm):                                  # static unroll
        off = Dm - 1 - d
        tgt = jax.lax.slice_in_dim(tgt_full, off, off + W, axis=2)
        prod = ref * tgt                                 # zeros where w < d (left pad)
        grp = jnp.mean(prod.reshape(G, cpg, tH, W), axis=1)
        out_ref[0, :, d] = grp


@functools.lru_cache(maxsize=None)
def _gwc_call(B, C, H, W, Dm, G, tH):
    cpg = C // G
    call = pl.pallas_call(
        functools.partial(_gwc_kernel, G=G, cpg=cpg, Dm=Dm, W=W),
        out_shape=jax.ShapeDtypeStruct((B, G, Dm, H, W), jnp.float32),
        grid=(B, H // tH),
        in_specs=[
            pl.BlockSpec((1, C, tH, W), lambda b, h: (b, 0, h, 0)),
            pl.BlockSpec((1, C, tH, W + Dm - 1), lambda b, h: (b, 0, h, 0)),
        ],
        out_specs=pl.BlockSpec((1, G, Dm, tH, W), lambda b, h: (b, 0, 0, h, 0)),
        compiler_params=pltpu.CompilerParams(
            dimension_semantics=("parallel", "parallel"),
            vmem_limit_bytes=VMEM_LIMIT),
    )
    return jax.jit(call)


def pallas_gwc_volume(ref, tgt, maxdisp, num_groups):
    B, C, H, W = ref.shape
    tH = 8 if H % 8 == 0 else H
    tgt_pad = jnp.pad(tgt.astype(jnp.float32),
                      ((0, 0), (0, 0), (0, 0), (maxdisp - 1, 0)))
    fn = _gwc_call(B, C, H, W, maxdisp, num_groups, tH)
    return fn(ref.astype(jnp.float32), tgt_pad)          # (B, G, Dm, H, W)


def shift_right_w(x, i):
    if i == 0:
        return x
    pad = [(0, 0)] * (x.ndim - 1) + [(i, 0)]
    return jnp.pad(x[..., :-i], pad)


# ----------------------------------------------------------------------------
# Pallas kernel 4: softmax over disparity + disparity regression, tiled over HW.
# ----------------------------------------------------------------------------
def _disp_kernel(v_ref, sim_ref, pred_ref):
    v = v_ref[0]                                          # (D, t)
    m = jnp.max(v, axis=0, keepdims=True)
    e = jnp.exp(v - m)
    p = e * pl.reciprocal(jnp.sum(e, axis=0, keepdims=True), approx=True)
    sim_ref[0] = p
    d = jax.lax.broadcasted_iota(jnp.float32, p.shape, 0)
    pred_ref[0] = jnp.sum(p * d, axis=0, keepdims=True)


@functools.lru_cache(maxsize=None)
def _disp_call(B, D, HWp, t):
    call = pl.pallas_call(
        _disp_kernel,
        out_shape=(jax.ShapeDtypeStruct((B, D, HWp), jnp.float32),
                   jax.ShapeDtypeStruct((B, 1, HWp), jnp.float32)),
        grid=(B, HWp // t),
        in_specs=[pl.BlockSpec((1, D, t), lambda b, i: (b, 0, i))],
        out_specs=(pl.BlockSpec((1, D, t), lambda b, i: (b, 0, i)),
                   pl.BlockSpec((1, 1, t), lambda b, i: (b, 0, i))),
        compiler_params=pltpu.CompilerParams(
            dimension_semantics=("parallel", "parallel"),
            vmem_limit_bytes=VMEM_LIMIT),
    )
    return jax.jit(call)


def pallas_disparity_softmax(vol):
    """vol: (B, D, H, W) -> (softmax over D, expected disparity (B,1,H,W))."""
    B, D, H, W = vol.shape
    HW = H * W
    t = min(2048, rup(HW, 128))
    HWp = rup(HW, t)
    vf = jnp.pad(vol.reshape(B, D, HW).astype(jnp.float32),
                 ((0, 0), (0, 0), (0, HWp - HW)))
    sim, pred = _disp_call(B, D, HWp, t)(vf)
    return (sim[:, :, :HW].reshape(B, D, H, W),
            pred[:, :, :HW].reshape(B, 1, H, W))


# ----------------------------------------------------------------------------
# Conv glue: im2col (JAX) + Pallas matmul with fused bias/BN/ReLU epilogue.
# ----------------------------------------------------------------------------
def conv_nd(x, w, b=None, stride=1, pad=0, dil=1, transpose=False, out_pad=0,
            scale=1.0, relu=False):
    cout = w.shape[0]
    ks = w.shape[2:]
    nd = len(ks)
    if transpose:
        # True transposed conv: conv over the lhs-dilated input with a spatially
        # flipped kernel.  Weights are stored (cout, cin, *k), i.e. the PyTorch
        # ConvTranspose weight with in/out channels already swapped.
        w = jnp.flip(w, axis=tuple(range(2, 2 + nd)))
        lhs_dil = (stride,) * nd
        strides = (1,) * nd
        padding = [(k - 1 - pad, k - 1 - pad + out_pad) for k in ks]
        rhs_dil = (1,) * nd
    else:
        lhs_dil = (1,) * nd
        strides = (stride,) * nd
        padding = [(pad, pad)] * nd
        rhs_dil = (dil,) * nd
    patches = jax.lax.conv_general_dilated_patches(
        x.astype(jnp.bfloat16), ks, strides, padding,
        lhs_dilation=lhs_dil, rhs_dilation=rhs_dil)
    N = x.shape[0]
    K = patches.shape[1]
    sp = patches.shape[2:]
    pm = jnp.moveaxis(patches, 1, -1).reshape(-1, K)
    wm = w.reshape(cout, K).T
    y = pallas_matmul(pm, wm, scale=scale, bias=b, relu=relu)
    y = y.reshape((N,) + sp + (cout,))
    return jnp.moveaxis(y, -1, 1)


# ----------------------------------------------------------------------------
# Deterministic parameter init (mirrors the torch init loop: N(0, sqrt(2/n)))
# ----------------------------------------------------------------------------
class ParamInit:
    def __init__(self, seed=42):
        self.key = jax.random.PRNGKey(seed)

    def normal(self, shape, std):
        self.key, sub = jax.random.split(self.key)
        return std * jax.random.normal(sub, shape, jnp.float32)


def Conv2D(init, cin, cout, k, stride, pad, dilation=1, activation=None, norm=None):
    return {'w': init.normal((cout, cin, k, k), math.sqrt(2.0 / (k * k * cout))),
            'b': None if norm == 'batch' else jnp.zeros((cout,), jnp.float32),
            'stride': stride, 'pad': pad, 'dil': dilation, 'act': activation,
            'norm': norm, 'transpose': False, 'out_pad': 0}


def Conv3D(init, cin, cout, k, stride, pad, dilation=1, activation=None, norm=None):
    return {'w': init.normal((cout, cin, k, k, k), math.sqrt(2.0 / (k * k * k * cout))),
            'b': None if norm == 'batch' else jnp.zeros((cout,), jnp.float32),
            'stride': stride, 'pad': pad, 'dil': dilation, 'act': activation,
            'norm': norm, 'transpose': False, 'out_pad': 0}


def Deconv3D(init, cin, cout, k, stride, pad, out_pad, activation=None, norm=None):
    return {'w': init.normal((cout, cin, k, k, k), math.sqrt(2.0 / (k * k * k * cout))),
            'b': None if norm == 'batch' else jnp.zeros((cout,), jnp.float32),
            'stride': stride, 'pad': pad, 'dil': 1, 'act': activation,
            'norm': norm, 'transpose': True, 'out_pad': out_pad}


def apply_layer(p, x):
    # bias / eval-BN scale / ReLU are fused into the matmul epilogue.
    scale = BN_SCALE if p['norm'] == 'batch' else 1.0
    relu = p['act'] == 'relu'
    return conv_nd(x, p['w'], p['b'], p['stride'], p['pad'], p['dil'],
                   p['transpose'], p['out_pad'], scale=scale, relu=relu)


def apply_seq(layers, x):
    for l in layers:
        x = apply_layer(l, x)
    return x


# ----------------------------------------------------------------------------
# feature_extraction
# ----------------------------------------------------------------------------
def BasicBlock(init, inplanes, planes, stride, downsample, pad, dilation):
    p1 = pad if dilation == 1 else dilation
    return {'conv1': Conv2D(init, inplanes, planes, 3, stride, p1, dilation, 'relu', 'batch'),
            'conv2': Conv2D(init, planes, planes, 3, 1, p1, dilation, None, 'batch'),
            'down': downsample}


def apply_basicblock(b, x):
    out = apply_layer(b['conv2'], apply_layer(b['conv1'], x))
    sc = x if b['down'] is None else apply_layer(b['down'], x)
    return out + sc


def make_feature_extraction(init, concat_channels=12):
    in_ch = 32
    fe = {'conv_1': Conv2D(init, 3, in_ch, 3, 1, 1, 1, 'relu', 'batch')}
    state = {'inplanes': in_ch}

    def make_layer(planes, blocks, stride, pad, dilation):
        down = None
        if stride != 1 or state['inplanes'] != planes:
            down = Conv2D(init, state['inplanes'], planes, 1, stride, 0, 1, None, 'batch')
        layers = [BasicBlock(init, state['inplanes'], planes, stride, down, pad, dilation)]
        state['inplanes'] = planes
        for _ in range(1, blocks):
            layers.append(BasicBlock(init, state['inplanes'], planes, 1, None, pad, dilation))
        return layers

    fe['layer1'] = make_layer(in_ch, 3, 2, 1, 1)
    fe['layer2'] = make_layer(in_ch * 2, 3, 2, 1, 1)
    fe['layer3'] = make_layer(in_ch * 4, 3, 1, 1, 1)
    fe['layer4'] = make_layer(in_ch * 4, 3, 1, 1, 2)
    fe['lastconv'] = [Conv2D(init, in_ch * 10, in_ch * 4, 3, 1, 1, 1, 'relu', 'batch'),
                      Conv2D(init, in_ch * 4, concat_channels, 1, 1, 0, 1, None, None)]
    return fe


def apply_feature_extraction(fe, x):
    x1 = apply_layer(fe['conv_1'], x)
    l1 = x1
    for b in fe['layer1']:
        l1 = apply_basicblock(b, l1)
    l2 = l1
    for b in fe['layer2']:
        l2 = apply_basicblock(b, l2)
    l3 = l2
    for b in fe['layer3']:
        l3 = apply_basicblock(b, l3)
    l4 = l3
    for b in fe['layer4']:
        l4 = apply_basicblock(b, l4)
    gwc = jnp.concatenate([l2, l3, l4], axis=1)
    concat = apply_seq(fe['lastconv'], gwc)
    return {'gwc_feature': gwc, 'concat_feature': concat}


# ----------------------------------------------------------------------------
# pyramid pooling / adaptive avg pool (glue)
# ----------------------------------------------------------------------------
def pool_matrix(n_in, n_out):
    m = np.zeros((n_out, n_in), np.float32)
    for i in range(n_out):
        s = (i * n_in) // n_out
        e = -(-((i + 1) * n_in) // n_out)
        m[i, s:e] = 1.0 / (e - s)
    return jnp.asarray(m)


def adaptive_avg_pool3d(x, size):
    _, _, d, h, w = x.shape
    y = jnp.einsum('bcdhw,ed->bcehw', x, pool_matrix(d, size))
    y = jnp.einsum('bcehw,fh->bcefw', y, pool_matrix(h, size))
    y = jnp.einsum('bcefw,gw->bcefg', y, pool_matrix(w, size))
    return y


def pyramid_pooling(x, sizes=(1, 3, 6, 8)):
    b, c = x.shape[:2]
    priors = [adaptive_avg_pool3d(x, s).reshape(b, c, -1) for s in sizes]
    return jnp.concatenate(priors, axis=-1)


# ----------------------------------------------------------------------------
# channel_propagate / spatial_propagate
# ----------------------------------------------------------------------------
def make_cp(init, c):
    return {'q': Conv3D(init, c, c, 1, 1, 0, 1, None, 'batch'),
            'k': Conv3D(init, c, c, 1, 1, 0, 1, None, 'batch'),
            'v': Conv3D(init, c, c, 1, 1, 0, 1, None, 'batch')}


def apply_cp(cp, x):
    b, c, d, h, w = x.shape
    q = pyramid_pooling(apply_layer(cp['q'], x))                       # (b, c, 756)
    k = pyramid_pooling(apply_layer(cp['k'], x))                       # (b, c, 756)
    v = apply_layer(cp['v'], x).reshape(b, c, -1)                      # (b, c, dhw)
    ctx, aff = pallas_attention(q, jnp.transpose(k, (0, 2, 1)), v, 1.0)
    return ctx.reshape(b, c, d, h, w), aff


def make_sp(init, c, scale=4):
    ch = c // scale
    return {'q': Conv3D(init, c, ch, 1, 1, 0, 1, None, 'batch'),
            'k': Conv3D(init, c, ch, 1, 1, 0, 1, None, 'batch'),
            'v': Conv3D(init, c, ch, 1, 1, 0, 1, None, 'batch'),
            'conv': Conv3D(init, ch, c, 1, 1, 0, 1, None, 'batch'),
            'ch': ch}


def apply_sp(sp, x):
    b, c, d, h, w = x.shape
    ch = sp['ch']
    q = jnp.transpose(apply_layer(sp['q'], x).reshape(b, ch, -1), (0, 2, 1))   # (b, dhw, ch)
    k = pyramid_pooling(apply_layer(sp['k'], x))                               # (b, ch, 756)
    v = jnp.transpose(pyramid_pooling(apply_layer(sp['v'], x)), (0, 2, 1))     # (b, 756, ch)
    ctx, aff = pallas_attention(q, k, v, ch ** (-0.5))
    context = jnp.transpose(ctx, (0, 2, 1)).reshape(b, ch, d, h, w)
    context = apply_layer(sp['conv'], context)
    return context, aff.reshape(b, d, h, w, -1)


# ----------------------------------------------------------------------------
# hourglass
# ----------------------------------------------------------------------------
def make_hourglass(init, c):
    return {'conv1': Conv3D(init, c, c * 2, 3, 2, 1, 1, 'relu', 'batch'),
            'conv2': Conv3D(init, c * 2, c * 2, 3, 1, 1, 1, 'relu', 'batch'),
            'conv3': Conv3D(init, c * 2, c * 4, 3, 2, 1, 1, 'relu', 'batch'),
            'conv4': Conv3D(init, c * 4, c * 4, 3, 1, 1, 1, 'relu', 'batch'),
            'cp': make_cp(init, c * 4),
            'conv_cp': Conv3D(init, c * 8, c * 4, 1, 1, 0, 1, 'relu', 'batch'),
            'sp': make_sp(init, c * 4),
            'conv_sp': Conv3D(init, c * 8, c * 4, 1, 1, 0, 1, 'relu', 'batch'),
            'conv5': Deconv3D(init, c * 4, c * 2, 3, 2, 1, 1, None, 'batch'),
            'conv6': Deconv3D(init, c * 2, c, 3, 2, 1, 1, None, 'batch'),
            'redir1': Conv3D(init, c, c, 1, 1, 0, 1, None, 'batch'),
            'redir2': Conv3D(init, c * 2, c * 2, 1, 1, 0, 1, None, 'batch')}


def apply_hourglass(hg, x):
    conv1 = apply_layer(hg['conv1'], x)
    conv2 = apply_layer(hg['conv2'], conv1)
    conv3 = apply_layer(hg['conv3'], conv2)
    conv4 = apply_layer(hg['conv4'], conv3)
    cp, acc = apply_cp(hg['cp'], conv4)
    conv_cp = apply_layer(hg['conv_cp'], jnp.concatenate([conv4, cp], axis=1))
    sp, ass = apply_sp(hg['sp'], conv4)
    conv_sp = apply_layer(hg['conv_sp'], jnp.concatenate([conv4, sp], axis=1))
    conv5 = jax.nn.relu(apply_layer(hg['conv5'], conv_cp + conv_sp)
                        + apply_layer(hg['redir2'], conv2))
    conv6 = jax.nn.relu(apply_layer(hg['conv6'], conv5)
                        + apply_layer(hg['redir1'], x))
    return conv6, acc, ass


# ----------------------------------------------------------------------------
# similarity_computation
# ----------------------------------------------------------------------------
def build_concat_volume(ref, tgt, maxdisp):
    # kept in bf16: halves the HBM footprint of the cost volume (MXU operands
    # of the following Conv3D are bf16 anyway).
    ref = ref.astype(jnp.bfloat16)
    tgt = tgt.astype(jnp.bfloat16)
    B, C, H, W = ref.shape
    wids = jnp.arange(W)
    refs, tgts = [], []
    for d in range(maxdisp):
        mask = (wids >= d).astype(ref.dtype)
        refs.append(ref * mask)
        tgts.append(shift_right_w(tgt, d))
    ref_vol = jnp.stack(refs, axis=2)
    tgt_vol = jnp.stack(tgts, axis=2)
    return jnp.concatenate([ref_vol, tgt_vol], axis=1)


def make_sc(init, maxdisp4, num_groups, concat_channels):
    return {'compress': [Conv3D(init, num_groups + concat_channels * 2, 32, 3, 1, 1, 1, 'relu', 'batch'),
                         Conv3D(init, 32, 32, 3, 1, 1, 1, 'relu', 'batch')],
            'maxdisp': maxdisp4, 'G': num_groups}


def apply_sc(sc, fl, fr):
    gwc = pallas_gwc_volume(fl['gwc_feature'], fr['gwc_feature'], sc['maxdisp'], sc['G'])
    cat = build_concat_volume(fl['concat_feature'], fr['concat_feature'], sc['maxdisp'])
    vol = jnp.concatenate([gwc.astype(jnp.bfloat16), cat], axis=1)
    return apply_seq(sc['compress'], vol)


# ----------------------------------------------------------------------------
# feedback_refine (ShuffleBlock / EdgeBlock / SEBlock definitions are not in the
# source; reasonable approximations are used below)
# ----------------------------------------------------------------------------
def ShuffleBlock(init, cin, cout, stride, dilation):
    # TODO(synk): ShuffleBlock definition not provided; approximated as a dilated
    # 3x3 conv+BN+ReLU followed by a 2-group channel shuffle.
    return {'conv': Conv2D(init, cin, cout, 3, stride, dilation, dilation, 'relu', 'batch'),
            'groups': 2}


def apply_shuffle(sb, x):
    y = apply_layer(sb['conv'], x)
    b, c, h, w = y.shape
    g = sb['groups']
    return jnp.transpose(y.reshape(b, g, c // g, h, w), (0, 2, 1, 3, 4)).reshape(b, c, h, w)


def bilinear_resize(x, out_h, out_w):
    # align_corners=True bilinear (matches F.interpolate(..., align_corners=True))
    b, c, h, w = x.shape

    def coords(n_in, n_out):
        if n_out == 1 or n_in == 1:
            return jnp.zeros((n_out,), jnp.float32)
        return jnp.linspace(0.0, n_in - 1.0, n_out)

    ys, xs = coords(h, out_h), coords(w, out_w)
    y0 = jnp.floor(ys).astype(jnp.int32)
    x0 = jnp.floor(xs).astype(jnp.int32)
    y1 = jnp.minimum(y0 + 1, h - 1)
    x1 = jnp.minimum(x0 + 1, w - 1)
    wy = (ys - y0.astype(jnp.float32)).reshape(1, 1, out_h, 1)
    wx = (xs - x0.astype(jnp.float32)).reshape(1, 1, 1, out_w)

    def g(yi, xi):
        return x[:, :, yi, :][:, :, :, xi]

    top = g(y0, x0) * (1 - wx) + g(y0, x1) * wx
    bot = g(y1, x0) * (1 - wx) + g(y1, x1) * wx
    return top * (1 - wy) + bot * wy


def EdgeBlock(init, ch):
    # TODO(synk): EdgeBlock definition not provided; approximated as fusion of the
    # high-res feature with the upsampled low-res feature + a 1-channel edge map.
    return {'hi': Conv2D(init, ch, ch, 3, 1, 1, 1, 'relu', 'batch'),
            'lo': Conv2D(init, ch * 2, ch, 1, 1, 0, 1, 'relu', 'batch'),
            'fuse': Conv2D(init, ch, ch, 3, 1, 1, 1, 'relu', 'batch'),
            'edge': Conv2D(init, ch, 1, 3, 1, 1, 1, None, None)}


def apply_edgeblock(eb, hi, lo):
    _, _, H, W = hi.shape
    lo_up = bilinear_resize(lo, H, W)
    f = apply_layer(eb['fuse'], apply_layer(eb['hi'], hi) + apply_layer(eb['lo'], lo_up))
    e = jax.nn.sigmoid(apply_layer(eb['edge'], f))
    return f, e


def SEBlock(init, ch, r=4):
    # TODO(synk): SEBlock definition not provided; standard squeeze-and-excitation.
    return {'w1': init.normal((ch, ch // r), math.sqrt(2.0 / ch)),
            'b1': jnp.zeros((ch // r,), jnp.float32),
            'w2': init.normal((ch // r, ch), math.sqrt(2.0 / (ch // r))),
            'b2': jnp.zeros((ch,), jnp.float32)}


def apply_seblock(se, x):
    s = x.mean(axis=(2, 3))                                          # (b, c)
    h1 = pallas_matmul(s, se['w1'], bias=se['b1'], relu=True)
    a = jax.nn.sigmoid(pallas_matmul(h1, se['w2'], bias=se['b2']))
    return x * a[:, :, None, None], a


def make_feedback_refine(init):
    ip = 32
    return {'l_1': Conv2D(init, 3, ip, 3, 1, 1, 1, 'relu', 'batch'),
            'l_2': [ShuffleBlock(init, ip, ip, 2, 2), ShuffleBlock(init, ip, ip, 1, 1),
                    ShuffleBlock(init, ip, ip * 2, 2, 2), ShuffleBlock(init, ip * 2, ip * 2, 1, 1)],
            'd_1': Conv2D(init, 1, ip, 3, 1, 1, 1, 'relu', 'batch'),
            'd_2': [ShuffleBlock(init, ip, ip, 2, 2), ShuffleBlock(init, ip, ip, 1, 1),
                    ShuffleBlock(init, ip, ip * 2, 2, 2), ShuffleBlock(init, ip * 2, ip * 2, 1, 1)],
            'e1': EdgeBlock(init, ip), 'e2': EdgeBlock(init, ip),
            'se': SEBlock(init, ip * 2),
            'fd1': ShuffleBlock(init, ip * 2, ip * 2, 1, 2),
            'fd2': Conv2D(init, ip * 2, ip * 2, 3, 1, 1, 1, 'relu', 'batch'),
            'output': [Conv2D(init, ip * 2, ip, 3, 1, 1, 1, 'relu', 'batch'),
                       Conv2D(init, ip, 1, 3, 1, 1, 1, 'relu', 'batch')]}


def apply_feedback_refine(fr, left, disparity):
    l_1 = apply_layer(fr['l_1'], left)
    l_2 = l_1
    for sb in fr['l_2']:
        l_2 = apply_shuffle(sb, l_2)
    d_1 = apply_layer(fr['d_1'], disparity)
    d_2 = d_1
    for sb in fr['d_2']:
        d_2 = apply_shuffle(sb, d_2)
    eb1, e_rgb = apply_edgeblock(fr['e1'], l_1, l_2)
    eb2, e_disp = apply_edgeblock(fr['e2'], d_1, d_2)
    eb, e_f = apply_seblock(fr['se'], jnp.concatenate([eb1, eb2], axis=1))
    fd1 = apply_shuffle(fr['fd1'], jnp.concatenate([l_1, d_1], axis=1)) + eb
    fd2 = apply_layer(fr['fd2'], fd1) + eb
    edge = apply_seq(fr['output'], fd2)
    return edge, eb, e_rgb, e_disp, e_f, fd2


# ----------------------------------------------------------------------------
# CalNet
# ----------------------------------------------------------------------------
def make_calnet(init, maxdisp, num_groups=40, concat_channels=12):
    def classif():
        return [Conv3D(init, 32, 32, 3, 1, 1, 1, 'relu', 'batch'),
                Conv3D(init, 32, 4, 3, 1, 1, 1, None, None)]

    return {'maxdisp': maxdisp,
            'fe': make_feature_extraction(init, concat_channels),
            'sc': make_sc(init, maxdisp // 4, num_groups, concat_channels),
            'hg1': make_hourglass(init, 32),
            'hg2': make_hourglass(init, 32),
            'hg3': make_hourglass(init, 32),
            'classif0': classif(), 'classif1': classif(),
            'classif2': classif(), 'classif3': classif(),
            'fr': make_feedback_refine(init)}


def calnet_forward(net, left, right):
    H, W = left.shape[2], left.shape[3]
    fl = apply_feature_extraction(net['fe'], left)
    frt = apply_feature_extraction(net['fe'], right)
    volume = apply_sc(net['sc'], fl, frt)
    b, _, _, h, w = volume.shape

    volume1, _, _ = apply_hourglass(net['hg1'], volume)
    h2, _, _ = apply_hourglass(net['hg2'], volume1)
    volume2 = h2 + volume
    h3, a1, a2 = apply_hourglass(net['hg3'], volume2)
    volume3 = h3 + volume

    def head(classif, vol):
        c = apply_seq(classif, vol)                                   # (b, 4, D, h, w)
        c = jnp.transpose(c, (0, 2, 1, 3, 4)).reshape(b, -1, h, w)    # (b, maxdisp, h, w)
        up = bilinear_resize(c, H, W)                                 # (b, maxdisp, H, W)
        sim, pred = pallas_disparity_softmax(up)                      # softmax + regression
        return sim, pred

    sim0, pred0 = head(net['classif0'], volume)
    sim1, pred1 = head(net['classif1'], volume1)
    sim2, pred2 = head(net['classif2'], volume2)
    sim3, pred3 = head(net['classif3'], volume3)

    residual3, eb, e_rgb, e_disp, e_f, fd2 = apply_feedback_refine(net['fr'], left, pred3)
    pred4 = residual3 + pred3

    pred3s = pred3[:, 0]
    pred4s = pred4[:, 0]
    # eval-mode return (training losses / crossentropy_loss / smooth_l1_loss skipped)
    return ([pred3s, pred4s], [residual3], sim3, a1, a2, eb, e_rgb, e_disp, e_f, fd2)


if __name__ == "__main__":
    key = jax.random.PRNGKey(0)
    k1, k2 = jax.random.split(key)
    left = jax.random.normal(k1, (1, 3, 32, 32), jnp.float32)
    right = jax.random.normal(k2, (1, 3, 32, 32), jnp.float32)

    init = ParamInit(seed=0)
    net = make_calnet(init, maxdisp=16, num_groups=40, concat_channels=12)

    out = calnet_forward(net, left, right)
    jax.block_until_ready(jax.tree_util.tree_leaves(out))
    print("KERNEL_OK")
</pallas_src>

<mosaic_0001>
module attributes {stable_mosaic.version = 11 : i64} {
  func.func @_mm_kernel(%arg0: i32, %arg1: i32, %arg2: i32, %arg3: memref<256x128xbf16, #tpu.memory_space<vmem>>, %arg4: memref<128x128xbf16, #tpu.memory_space<vmem>>, %arg5: memref<1x128xf32, #tpu.memory_space<vmem>>, %arg6: memref<256x128xf32, #tpu.memory_space<vmem>>, %arg7: memref<256x128xf32, #tpu.memory_space<vmem>>) attributes {dimension_semantics = [#tpu.dimension_semantics<parallel>, #tpu.dimension_semantics<parallel>, #tpu.dimension_semantics<arbitrary>], iteration_bounds = array<i64: 4, 1, 1>, scalar_prefetch = 0 : i64, scratch_operands = 1 : i64, tpu.core_type = #tpu.core_type<tc>, window_params = [{transform_indices = @transform_0, window_bounds = array<i64: 256, 128>}, {transform_indices = @transform_1, window_bounds = array<i64: 128, 128>}, {transform_indices = @transform_2, window_bounds = array<i64: 1, 128>}, {transform_indices = @transform_3, window_bounds = array<i64: 256, 128>}]} {
    %c0_i32 = arith.constant 0 : i32
    %0 = arith.cmpi eq, %arg2, %c0_i32 : i32
    %1 = arith.extui %0 : i1 to i32
    %c0_i32_0 = arith.constant 0 : i32
    %2 = arith.cmpi ne, %1, %c0_i32_0 : i32
    scf.if %2 {
      %cst_10 = arith.constant 0.000000e+00 : f32
      %12 = vector.broadcast %cst_10 : f32 to vector<256x128xf32>
      %c0_11 = arith.constant 0 : index
      %c0_12 = arith.constant 0 : index
      %13 = vector.load %arg7[%c0_11, %c0_12] : memref<256x128xf32, #tpu.memory_space<vmem>>, vector<256x128xf32>
      tpu.vector_store %arg7[%c0_11, %c0_12], %12 {strides = array<i32>} : memref<256x128xf32, #tpu.memory_space<vmem>>, vector<256x128xf32>,
    } else {
    }
    %c0 = arith.constant 0 : index
    %c0_1 = arith.constant 0 : index
    %3 = vector.load %arg7[%c0, %c0_1] : memref<256x128xf32, #tpu.memory_space<vmem>>, vector<256x128xf32>
    %c0_2 = arith.constant 0 : index
    %c0_3 = arith.constant 0 : index
    %4 = vector.load %arg3[%c0_2, %c0_3] : memref<256x128xbf16, #tpu.memory_space<vmem>>, vector<256x128xbf16>
    %c0_4 = arith.constant 0 : index
    %c0_5 = arith.constant 0 : index
    %5 = vector.load %arg4[%c0_4, %c0_5] : memref<128x128xbf16, #tpu.memory_space<vmem>>, vector<128x128xbf16>
    %cst = arith.constant dense<0.000000e+00> : vector<256x128xf32>
    %6 = tpu.matmul %4, %5, %cst {dimension_numbers = #tpu.dot_dimension_numbers<[1], [0], [0], [1], [0, 0, 1, 1], [], []>} : vector<256x128xbf16>, vector<128x128xbf16>, vector<256x128xf32> -> vector<256x128xf32>
    %7 = arith.addf %3, %6 : vector<256x128xf32>
    %c0_6 = arith.constant 0 : index
    %c0_7 = arith.constant 0 : index
    %8 = vector.load %arg7[%c0_6, %c0_7] : memref<256x128xf32, #tpu.memory_space<vmem>>, vector<256x128xf32>
    tpu.vector_store %arg7[%c0_6, %c0_7], %7 {strides = array<i32>} : memref<256x128xf32, #tpu.memory_space<vmem>>, vector<256x128xf32>,
    %c0_i32_8 = arith.constant 0 : i32
    %9 = arith.cmpi eq, %arg2, %c0_i32_8 : i32
    %10 = arith.extui %9 : i1 to i32
    %c0_i32_9 = arith.constant 0 : i32
    %11 = arith.cmpi ne, %10, %c0_i32_9 : i32
    scf.if %11 {
      %c0_10 = arith.constant 0 : index
      %c0_11 = arith.constant 0 : index
      %12 = vector.load %arg7[%c0_10, %c0_11] : memref<256x128xf32, #tpu.memory_space<vmem>>, vector<256x128xf32>
      %cst_12 = arith.constant 0.999994993 : f32
      %13 = vector.broadcast %cst_12 : f32 to vector<256x128xf32>
      %14 = arith.mulf %12, %13 : vector<256x128xf32>
      %c0_13 = arith.constant 0 : index
      %c0_14 = arith.constant 0 : index
      %15 = vector.load %arg5[%c0_13, %c0_14] : memref<1x128xf32, #tpu.memory_space<vmem>>, vector<1x128xf32>
      %16 = vector.broadcast %15 : vector<1x128xf32> to vector<256x128xf32>
      %17 = arith.addf %14, %16 : vector<256x128xf32>
      %cst_15 = arith.constant 0.000000e+00 : f32
      %18 = vector.broadcast %cst_15 : f32 to vector<256x128xf32>
      %19 = arith.maximumf %17, %18 : vector<256x128xf32>
      %c0_16 = arith.constant 0 : index
      %c0_17 = arith.constant 0 : index
      %20 = vector.load %arg6[%c0_16, %c0_17] : memref<256x128xf32, #tpu.memory_space<vmem>>, vector<256x128xf32>
      tpu.vector_store %arg6[%c0_16, %c0_17], %19 {strides = array<i32>} : memref<256x128xf32, #tpu.memory_space<vmem>>, vector<256x128xf32>,
    } else {
    }
    return
  }
  func.func @transform_0(%arg0: i32, %arg1: i32, %arg2: i32) -> (i32, i32) {
    %c0_i32 = arith.constant 0 : i32
    return %arg0, %arg2 : i32, i32
  }
  func.func @transform_1(%arg0: i32, %arg1: i32, %arg2: i32) -> (i32, i32) {
    %c0_i32 = arith.constant 0 : i32
    return %arg2, %arg1 : i32, i32
  }
  func.func @transform_2(%arg0: i32, %arg1: i32, %arg2: i32) -> (i32, i32) {
    %c0_i32 = arith.constant 0 : i32
    %c0_i32_0 = arith.constant 0 : i32
    return %c0_i32, %arg1 : i32, i32
  }
  func.func @transform_3(%arg0: i32, %arg1: i32, %arg2: i32) -> (i32, i32) {
    %c0_i32 = arith.constant 0 : i32
    return %arg0, %arg1 : i32, i32
  }
}

</mosaic_0001>

<bundles_post_ra>
// kernel: tpu_custom_call.1
= control target key start
LH: loop header
LB: loop body
LE: loop exit
PB: predicated region body
PF: predicated region fallthrough
CT: control target
= control target key end

     0   :  { %s1630_s0 = inlined_call_operand.hbm [shape: bf16[1024,128], index: 0, kind: input, shape index: {}]   ;;  %s1631_s1 = inlined_call_operand.hbm [shape: bf16[128,128], index: 1, kind: input, shape index: {}]   ;;  %s1632_s2 = inlined_call_operand.vmem [shape: f32[1,128], index: 2, kind: input, shape index: {}]   ;;  %s1633_s3 = inlined_call_operand.hbm [shape: f32[1024,128], index: 3, kind: output, shape index: {}]  }
   0x1   :  { %1635 = sst [smem:[#allocation12_spill]] %s1631_s1 }
   0x2   :  { %8 = vsyncpa [#allocation4], 0 }
   0x3   :  { %10 = vsyncpa [#allocation4 + $0x1], 0 }
   0x4   :  { %11 = vsyncpa [#allocation7], 0 }
   0x5   :  { %12 = vsyncpa [#allocation5], 0 }
   0x6   :  { %14 = vsyncpa [#allocation5 + $0x1], 0  ;;  %s1386_s12 = smov 0   ;;  %s1388_s13 = smov 0  }
   0x7   :  { %s1390_s14 = smov 0   ;;  %s1392_s15 = smov 0  }
   0x8   :  { %s1394_s16 = smov 0   ;;  %s1396_s17 = smov 0  }
   0x9 LB: > { %s971_s18 = sadd.s32 4294967295, %s1359_s17   ;;  %s972_s19 = sadd.s32 4294967294, %s1359_s17   ;;  %s1359_s17 = sphi %s1396_s17, %s20_s17   ;;  %s1355_s16 = sphi %s1394_s16, %s1649_s16   ;;  %s1351_s15 = sphi %s1392_s15, %s1648_s15   ;;  %s1347_s14 = sphi %s1390_s14, %s1647_s14   ;;  %s1343_s13 = sphi %s1388_s13, %s1646_s13   ;;  %s1339_s12 = sphi %s1386_s12, %s1645_s12  }
   0xa   : > { %p61_p0 = scmp.ne.s32.totalorder %s1343_s13, %s1339_s12  ;;  %p1420_p1 = scmp.eq.s32.totalorder %s971_s18, 0 }
   0xb   : > { %p1424_p2 = scmp.eq.s32.totalorder %s971_s18, 3  ;;  %p147_p3 = scmp.eq.s32.totalorder %s972_s19, 3 }
   0xc   : > { %p1430_p4 = por %p1420_p1, %p61_p0  ;;  %p973_p5 = scmp.ge.s32.totalorder %s1359_s17, 1 }
   0xd   : > { %p1435_p6 = por %p147_p3, %p61_p0  ;;  %p154_p7 = scmp.lt.s32.totalorder %s1359_s17, 5 }
   0xe   : > { %s1640_s1 = sld [smem:[#allocation12_spill]]  ;;  %s1361_s28 = smov [#allocation6]  }
   0xf   : > { %p1443_p8 = pnand %p973_p5, %p154_p7  ;;  %s171_s29 = sshll.u32 %s1361_s28, 4  ;;  %s172_s29 = int_to_ptr.vmem [resolvable:$true] %s171_s29 }
  0x10   : > { %s1634_s30 = smov 64   ;;  %s1363_s4 = smov 4  }
  0x11   : > { %p1143_p9 = pneg %p1443_p8  ;;  %s39_s5 = sadd.s32 1, %s1355_s16 }
  0x12   : > { %p41_p11 = scmp.ge.s32.totalorder %s39_s5, 4  ;;  %s48_s6 = sadd.s32 1, %s1347_s14 }
  0x13   : > { %p1144_p10 = pnand %p1143_p9, %p1420_p1  ;;  %p55_p12 = scmp.ne.s32.totalorder %s1347_s14, %s1343_s13 }
  0x14   : > { %s169_s26 = sshll.u32 %s1640_s1, 4  ;;  %p56_p13 = scmp.eq.s32.totalorder %s1359_s17, 0  ;;  %s170_s26 = int_to_ptr.hbm [resolvable:$true] %s169_s26 }
  0x15   : > { %1146 = dma.hbm_to_vmem [thread:$0]  (!%p1144_p10), %s170_s26, 1024, %s172_s29, [#allocation7], %s1634_s30, %s1634_s30, %s1363_s4  }
  0x16   : > { %s1651_s5 = smov (%p41_p11, %s39_s5), 0  ;;  %p1461_p0 = por %p56_p13, %p55_p12 }
  0x17   : > { %p1467_p3 = por %p1424_p2, %p55_p12  ;;  %s43_s9 = ssub.s32 %s1355_s16, %s1651_s5 }
  0x18   : > { %p1156_p5 = scmp.lt.s32.totalorder %s1359_s17, 4  ;;  %p46_p7 = scmp.eq.s32.totalorder %s43_s9, 0 }
  0x19   : > { %s191_s10 = sand.u32 1, %s1347_s14   ;;  %s1085_s19 = sshll.u32 %s1355_s16, 7 }
  0x1a   : > { %s977_s11 = sshll.u32 %s191_s10, 7  ;;  %s201_s26 = scalar_lea.hbm %s1630_s0, %s1085_s19 }
  0x1b   : > { %s1476_s18 = scalar_select %p46_p7, %s1347_s14, %s48_s6  }
  0x1c   : > { %s195_s28 = scalar_lea.vmem [#allocation3], %s977_s11  ;;  %s202_s21 = sshll.u32 %s201_s26, 4  ;;  %s203_s21 = int_to_ptr.hbm [resolvable:$true] %s202_s21 }
  0x1d   : > { %s204_s29 = sshll.u32 %s195_s28, 4  ;;  %p1148_p2 = pnand %p1156_p5, %p1461_p0  ;;  %s205_s29 = int_to_ptr.vmem [resolvable:$true] %s204_s29 }
  0x1e   : > { %s192_s30 = scalar_lea.sflag [#allocation4], %s191_s10  ;;  %s1644_s1 = smov 64  }
  0x1f   : > { %1150 = dma.hbm_to_vmem [thread:$0]  (!%p1148_p2), %s203_s21, 2048, %s205_s29, %s192_s30, %s1644_s1, %s1644_s1, %s1363_s4  }
  0x20   : > { %216 = sbr.rel (%p1443_p8) target bundleno = 272 (0x110), region = 32  ;;  %s1490_s6 = sand.u32 (!%p1443_p8), 1, %s1343_s13  }
  0x21   : > { %s981_s9 = sshll.u32 (!%p1443_p8), %s1490_s6, 7  ;;  %s219_s11 = scalar_lea.sflag (!%p1443_p8), [#allocation4], %s1490_s6 }
  0x22   : > { %s1494_s19 = scalar_lea.vmem (!%p1443_p8), [#allocation3], %s981_s9 }
  0x25   : > { %1326 = dma.done.wait (%p1430_p4), %s219_s11, 2048  }
  0x26   : > { %1328 = vsyncadd (%p1430_p4), %s219_s11, 4294965248 }
  0x27   : > { %1330 = dma.done.wait (%p1420_p1), [#allocation7], 1024  }
  0x28   : > { %1332 = vsyncadd (%p1420_p1), [#allocation7], 4294966272  ;;  %v1109_v0 = vld [vmem:[#allocation6 + $0x38] sm:$0xff]  ;;  %v1108_v1 = vld [vmem:[#allocation6 + $0x30] sm:$0xff]  ;;  %s983_s22 = sshll.u32 %s1490_s6, 8  ;;  %s1110_s30 = sshll.u32 %s1351_s15, 8 }
  0x29   : > { %520 = vmatpush.bf16.msra.mxu0 %v1109_v0  ;;  %1111 = vmatpush.bf16.msra.mxu1 %v1109_v0  ;;  %v1107_v2 = vld [vmem:[#allocation6 + $0x28] sm:$0xff]  ;;  %v1106_v3 = vld [vmem:[#allocation6 + $0x20] sm:$0xff]  ;;  %v1105_v4 = vld [vmem:[#allocation6 + $0x18] sm:$0xff]  ;;  %s1528_s27 = scalar_lea.vmem [#allocation8], %s983_s22  ;;  %s853_s10 = scalar_lea.hbm %s1633_s3, %s1110_s30 }
  0x2a   : > { %1112 = vmatpush.bf16.msra.mxu2 %v1109_v0  ;;  %1113 = vmatpush.bf16.msra.mxu3 %v1109_v0  ;;  %v1104_v5 = vld [vmem:[#allocation6 + $0x10] sm:$0xff]  ;;  %v1103_v6 = vld [vmem:[#allocation6 + $0x8] sm:$0xff]  ;;  %v1102_v7 = vld [vmem:[#allocation6] sm:$0xff]  ;;  %s854_s15 = sshll.u32 %s1528_s27, 4  ;;  %s856_s24 = sshll.u32 %s853_s10, 4  ;;  %s855_s15 = int_to_ptr.vmem [resolvable:$true] %s854_s15  ;;  %s857_s24 = int_to_ptr.hbm [resolvable:$true] %s856_s24 }
  0x2b   : > { %v1086_v8 = vld [vmem:[%s1494_s19] sm:$0xff]  ;;  %v1087_v12 = vld [vmem:[%s1494_s19 + $0x8] sm:$0xff]  ;;  %v1088_v16 = vld [vmem:[%s1494_s19 + $0x10] sm:$0xff]  ;;  %s841_s25 = scalar_lea.sflag [#allocation5], %s1490_s6  ;;  %s1287_s26 = sshra.s32 %s857_s24, 4  ;;  %s1288_s26 = int_to_ptr.hbm [resolvable:$true] %s1287_s26 }
  0x2c   : > { %v1090_v9 = vld [vmem:[%s1494_s19 + $0x20] sm:$0xff]  ;;  %v1091_v13 = vld [vmem:[%s1494_s19 + $0x28] sm:$0xff]  ;;  %v1092_v17 = vld [vmem:[%s1494_s19 + $0x30] sm:$0xff]  ;;  %s1289_s28 = scalar_lea.hbm %s1288_s26, 256  ;;  %s1293_s9 = scalar_lea.hbm %s1633_s3, 1024 }
  0x2d   : > { %521 = vmatpush.bf16.msra.mxu0 %v1108_v1  ;;  %1114 = vmatpush.bf16.msra.mxu1 %v1108_v1  ;;  %v1094_v10 = vld [vmem:[%s1494_s19 + $0x40] sm:$0xff]  ;;  %v1095_v14 = vld [vmem:[%s1494_s19 + $0x48] sm:$0xff]  ;;  %v1096_v18 = vld [vmem:[%s1494_s19 + $0x50] sm:$0xff]  ;;  %p1290_p1 = scmp.ne.s32.totalorder %s1288_s26, %s1289_s28  ;;  %p1294_p9 = scmp.lt.s32.totalorder %s1288_s26, %s1633_s3 }
  0x2e   : > { %1115 = vmatpush.bf16.msra.mxu2 %v1108_v1  ;;  %1116 = vmatpush.bf16.msra.mxu3 %v1108_v1  ;;  %v1098_v11 = vld [vmem:[%s1494_s19 + $0x60] sm:$0xff]  ;;  %v1099_v15 = vld [vmem:[%s1494_s19 + $0x68] sm:$0xff]  ;;  %v1100_v19 = vld [vmem:[%s1494_s19 + $0x70] sm:$0xff]  ;;  %p1295_p10 = scmp.lt.s32.totalorder %s1293_s9, %s1289_s28 }
  0x2f   : > { %v1089_v20 = vld [vmem:[%s1494_s19 + $0x18] sm:$0xff]  ;;  %v1523_v24 = vld [vmem:[%s1632_s2] ss:$0 sm:$0xff]  ;;  %p1291_p4 = pnand %p1290_p1, %p1467_p3 }
  0x30   : > { %v1093_v21 = vld [vmem:[%s1494_s19 + $0x38] sm:$0xff]  ;;  %p1296_p11 = por %p1295_p10, %p1294_p9 }
  0x31   : > { %522 = vmatpush.bf16.msra.mxu0 %v1107_v2  ;;  %1117 = vmatpush.bf16.msra.mxu1 %v1107_v2  ;;  %v1097_v22 = vld [vmem:[%s1494_s19 + $0x58] sm:$0xff]  ;;  %p1292_p8 = pneg %p1291_p4 }
  0x32   : > { %1118 = vmatpush.bf16.msra.mxu2 %v1107_v2  ;;  %1119 = vmatpush.bf16.msra.mxu3 %v1107_v2  ;;  %v1101_v23 = vld [vmem:[%s1494_s19 + $0x78] sm:$0xff] }
  0x33   : > { %p1297_p12 = pnand %p1296_p11, %p1292_p8 }
  0x35   : > { %523 = vmatpush.bf16.msra.mxu0 %v1106_v3  ;;  %1120 = vmatpush.bf16.msra.mxu1 %v1106_v3 }
  0x36   : > { %1121 = vmatpush.bf16.msra.mxu2 %v1106_v3  ;;  %1122 = vmatpush.bf16.msra.mxu3 %v1106_v3 }
  0x39   : > { %524 = vmatpush.bf16.msra.mxu0 %v1105_v4  ;;  %1123 = vmatpush.bf16.msra.mxu1 %v1105_v4 }
  0x3a   : > { %1124 = vmatpush.bf16.msra.mxu2 %v1105_v4  ;;  %1125 = vmatpush.bf16.msra.mxu3 %v1105_v4 }
  0x3d   : > { %525 = vmatpush.bf16.msra.mxu0 %v1104_v5  ;;  %1126 = vmatpush.bf16.msra.mxu1 %v1104_v5 }
  0x3e   : > { %1127 = vmatpush.bf16.msra.mxu2 %v1104_v5  ;;  %1128 = vmatpush.bf16.msra.mxu3 %v1104_v5 }
  0x41   : > { %526 = vmatpush.bf16.msra.mxu0 %v1103_v6  ;;  %1129 = vmatpush.bf16.msra.mxu1 %v1103_v6 }
  0x42   : > { %1130 = vmatpush.bf16.msra.mxu2 %v1103_v6  ;;  %1131 = vmatpush.bf16.msra.mxu3 %v1103_v6 }
  0x45   : > { %527 = vmatpush.bf16.msra.mxu0 %v1102_v7  ;;  %1132 = vmatpush.bf16.msra.mxu1 %v1102_v7 }
  0x46   : > { %1133 = vmatpush.bf16.msra.mxu2 %v1102_v7  ;;  %1134 = vmatpush.bf16.msra.mxu3 %v1102_v7 }
  0x48   : > { %528 = vmatmul.bf16.vlgmr.msra.gmra.mxu0 %v1086_v8  ;;  %548 = vmatmul.bf16.vlgmr.msra.gmra.mxu1 %v1090_v9 }
  0x49   : > { %568 = vmatmul.bf16.vlgmr.msra.gmra.mxu2 %v1094_v10  ;;  %588 = vmatmul.bf16.vlgmr.msra.gmra.mxu3 %v1098_v11 }
  0x58   : > { %533 = vmatmul.bf16.gmra.mxu0 %v1087_v12  ;;  %553 = vmatmul.bf16.gmra.mxu1 %v1091_v13 }
  0x59   : > { %573 = vmatmul.bf16.gmra.mxu2 %v1095_v14  ;;  %593 = vmatmul.bf16.gmra.mxu3 %v1099_v15 }
  0x68   : > { %538 = vmatmul.bf16.gmra.mxu0 %v1088_v16  ;;  %558 = vmatmul.bf16.gmra.mxu1 %v1092_v17 }
  0x69   : > { %578 = vmatmul.bf16.gmra.mxu2 %v1096_v18  ;;  %598 = vmatmul.bf16.gmra.mxu3 %v1100_v19 }
  0x78   : > { %543 = vmatmul.bf16.gmra.mxu0 %v1089_v20  ;;  %563 = vmatmul.bf16.gmra.mxu1 %v1093_v21 }
  0x79   : > { %583 = vmatmul.bf16.gmra.mxu2 %v1097_v22  ;;  %603 = vmatmul.bf16.gmra.mxu3 %v1101_v23 }
  0xc5   : > { %v529_v25 = vpop.f32.mrf.mxu0  ;;  %v549_v26 = vpop.f32.mrf.mxu1 }
  0xc6   : > { %v708_v27 = vmul.f32 0.999995, %v529_v25  ;;  %v716_v28 = vmul.f32 0.999995, %v549_v26 }
  0xc8   : > { %v744_v29 = vadd.f32 %v1523_v24, %v708_v27  ;;  %v752_v30 = vadd.f32 %v1523_v24, %v716_v28 }
  0xca   : > { %v776_v31 = vmax.f32 %v744_v29, 0.0  ;;  %v784_v32 = vmax.f32 %v752_v30, 0.0 }
  0xcc   : > { %808 = vst [vmem:[%s1528_s27] sm:$0xff] %v776_v31  ;;  %v569_v33 = vpop.f32.mrf.mxu2  ;;  %v589_v34 = vpop.f32.mrf.mxu3 }
  0xcd   : > { %816 = vst [vmem:[%s1528_s27 + $0x40] sm:$0xff] %v784_v32  ;;  %v724_v35 = vmul.f32 0.999995, %v569_v33  ;;  %v732_v36 = vmul.f32 0.999995, %v589_v34  ;;  %v531_v37 = vpop.f32.mrf.mxu0  ;;  %v551_v38 = vpop.f32.mrf.mxu1 }
  0xce   : > { %v709_v39 = vmul.f32 0.999995, %v531_v37  ;;  %v717_v40 = vmul.f32 0.999995, %v551_v38 }
  0xcf   : > { %v760_v41 = vadd.f32 %v1523_v24, %v724_v35  ;;  %v768_v42 = vadd.f32 %v1523_v24, %v732_v36 }
  0xd0   : > { %v745_v43 = vadd.f32 %v1523_v24, %v709_v39  ;;  %v753_v44 = vadd.f32 %v1523_v24, %v717_v40 }
  0xd1   : > { %v792_v45 = vmax.f32 %v760_v41, 0.0  ;;  %v800_v46 = vmax.f32 %v768_v42, 0.0 }
  0xd2   : > { %v777_v47 = vmax.f32 %v745_v43, 0.0  ;;  %v785_v48 = vmax.f32 %v753_v44, 0.0 }
  0xd3   : > { %824 = vst [vmem:[%s1528_s27 + $0x80] sm:$0xff] %v792_v45 }
  0xd4   : > { %832 = vst [vmem:[%s1528_s27 + $0xc0] sm:$0xff] %v800_v46  ;;  %v571_v49 = vpop.f32.mrf.mxu2  ;;  %v591_v50 = vpop.f32.mrf.mxu3 }
  0xd5   : > { %809 = vst [vmem:[%s1528_s27 + $0x8] sm:$0xff] %v777_v47  ;;  %v725_v51 = vmul.f32 0.999995, %v571_v49  ;;  %v733_v52 = vmul.f32 0.999995, %v591_v50  ;;  %v534_v53 = vpop.f32.mrf.mxu0  ;;  %v554_v54 = vpop.f32.mrf.mxu1 }
  0xd6   : > { %817 = vst [vmem:[%s1528_s27 + $0x48] sm:$0xff] %v785_v48  ;;  %v710_v55 = vmul.f32 0.999995, %v534_v53  ;;  %v718_v56 = vmul.f32 0.999995, %v554_v54 }
  0xd7   : > { %v761_v57 = vadd.f32 %v1523_v24, %v725_v51  ;;  %v769_v58 = vadd.f32 %v1523_v24, %v733_v52 }
  0xd8   : > { %v746_v59 = vadd.f32 %v1523_v24, %v710_v55  ;;  %v754_v60 = vadd.f32 %v1523_v24, %v718_v56 }
  0xd9   : > { %v793_v61 = vmax.f32 %v761_v57, 0.0  ;;  %v801_v62 = vmax.f32 %v769_v58, 0.0 }
  0xda   : > { %v778_v63 = vmax.f32 %v746_v59, 0.0  ;;  %v786_v0 = vmax.f32 %v754_v60, 0.0 }
  0xdb   : > { %825 = vst [vmem:[%s1528_s27 + $0x88] sm:$0xff] %v793_v61 }
  0xdc   : > { %833 = vst [vmem:[%s1528_s27 + $0xc8] sm:$0xff] %v801_v62  ;;  %v574_v1 = vpop.f32.mrf.mxu2  ;;  %v594_v2 = vpop.f32.mrf.mxu3 }
  0xdd   : > { %810 = vst [vmem:[%s1528_s27 + $0x10] sm:$0xff] %v778_v63  ;;  %v726_v3 = vmul.f32 0.999995, %v574_v1  ;;  %v734_v4 = vmul.f32 0.999995, %v594_v2  ;;  %v536_v5 = vpop.f32.mrf.mxu0  ;;  %v556_v6 = vpop.f32.mrf.mxu1 }
  0xde   : > { %818 = vst [vmem:[%s1528_s27 + $0x50] sm:$0xff] %v786_v0  ;;  %v711_v7 = vmul.f32 0.999995, %v536_v5  ;;  %v719_v8 = vmul.f32 0.999995, %v556_v6 }
  0xdf   : > { %v762_v9 = vadd.f32 %v1523_v24, %v726_v3  ;;  %v770_v10 = vadd.f32 %v1523_v24, %v734_v4 }
  0xe0   : > { %v747_v11 = vadd.f32 %v1523_v24, %v711_v7  ;;  %v755_v12 = vadd.f32 %v1523_v24, %v719_v8 }
  0xe1   : > { %v794_v13 = vmax.f32 %v762_v9, 0.0  ;;  %v802_v14 = vmax.f32 %v770_v10, 0.0 }
  0xe2   : > { %v779_v15 = vmax.f32 %v747_v11, 0.0  ;;  %v787_v16 = vmax.f32 %v755_v12, 0.0 }
  0xe3   : > { %826 = vst [vmem:[%s1528_s27 + $0x90] sm:$0xff] %v794_v13 }
  0xe4   : > { %834 = vst [vmem:[%s1528_s27 + $0xd0] sm:$0xff] %v802_v14  ;;  %v576_v17 = vpop.f32.mrf.mxu2  ;;  %v596_v18 = vpop.f32.mrf.mxu3 }
  0xe5   : > { %811 = vst [vmem:[%s1528_s27 + $0x18] sm:$0xff] %v779_v15  ;;  %v727_v19 = vmul.f32 0.999995, %v576_v17  ;;  %v735_v20 = vmul.f32 0.999995, %v596_v18  ;;  %v539_v21 = vpop.f32.mrf.mxu0  ;;  %v559_v22 = vpop.f32.mrf.mxu1 }
  0xe6   : > { %819 = vst [vmem:[%s1528_s27 + $0x58] sm:$0xff] %v787_v16  ;;  %v712_v23 = vmul.f32 0.999995, %v539_v21  ;;  %v720_v25 = vmul.f32 0.999995, %v559_v22 }
  0xe7   : > { %v763_v26 = vadd.f32 %v1523_v24, %v727_v19  ;;  %v771_v27 = vadd.f32 %v1523_v24, %v735_v20 }
  0xe8   : > { %v748_v28 = vadd.f32 %v1523_v24, %v712_v23  ;;  %v756_v29 = vadd.f32 %v1523_v24, %v720_v25 }
  0xe9   : > { %v795_v30 = vmax.f32 %v763_v26, 0.0  ;;  %v803_v31 = vmax.f32 %v771_v27, 0.0 }
  0xea   : > { %v780_v32 = vmax.f32 %v748_v28, 0.0  ;;  %v788_v33 = vmax.f32 %v756_v29, 0.0 }
  0xeb   : > { %827 = vst [vmem:[%s1528_s27 + $0x98] sm:$0xff] %v795_v30 }
  0xec   : > { %835 = vst [vmem:[%s1528_s27 + $0xd8] sm:$0xff] %v803_v31  ;;  %v579_v34 = vpop.f32.mrf.mxu2  ;;  %v599_v35 = vpop.f32.mrf.mxu3 }
  0xed   : > { %812 = vst [vmem:[%s1528_s27 + $0x20] sm:$0xff] %v780_v32  ;;  %v728_v36 = vmul.f32 0.999995, %v579_v34  ;;  %v736_v37 = vmul.f32 0.999995, %v599_v35  ;;  %v541_v38 = vpop.f32.mrf.mxu0  ;;  %v561_v39 = vpop.f32.mrf.mxu1 }
  0xee   : > { %820 = vst [vmem:[%s1528_s27 + $0x60] sm:$0xff] %v788_v33  ;;  %v713_v40 = vmul.f32 0.999995, %v541_v38  ;;  %v721_v41 = vmul.f32 0.999995, %v561_v39 }
  0xef   : > { %v764_v42 = vadd.f32 %v1523_v24, %v728_v36  ;;  %v772_v43 = vadd.f32 %v1523_v24, %v736_v37 }
  0xf0   : > { %v749_v44 = vadd.f32 %v1523_v24, %v713_v40  ;;  %v757_v45 = vadd.f32 %v1523_v24, %v721_v41 }
  0xf1   : > { %v796_v46 = vmax.f32 %v764_v42, 0.0  ;;  %v804_v47 = vmax.f32 %v772_v43, 0.0 }
  0xf2   : > { %v781_v48 = vmax.f32 %v749_v44, 0.0  ;;  %v789_v49 = vmax.f32 %v757_v45, 0.0 }
  0xf3   : > { %828 = vst [vmem:[%s1528_s27 + $0xa0] sm:$0xff] %v796_v46 }
  0xf4   : > { %836 = vst [vmem:[%s1528_s27 + $0xe0] sm:$0xff] %v804_v47  ;;  %v581_v50 = vpop.f32.mrf.mxu2  ;;  %v601_v51 = vpop.f32.mrf.mxu3 }
  0xf5   : > { %813 = vst [vmem:[%s1528_s27 + $0x28] sm:$0xff] %v781_v48  ;;  %v729_v52 = vmul.f32 0.999995, %v581_v50  ;;  %v737_v53 = vmul.f32 0.999995, %v601_v51  ;;  %v544_v54 = vpop.f32.mrf.mxu0  ;;  %v564_v55 = vpop.f32.mrf.mxu1 }
  0xf6   : > { %821 = vst [vmem:[%s1528_s27 + $0x68] sm:$0xff] %v789_v49  ;;  %v714_v56 = vmul.f32 0.999995, %v544_v54  ;;  %v722_v57 = vmul.f32 0.999995, %v564_v55 }
  0xf7   : > { %v765_v58 = vadd.f32 %v1523_v24, %v729_v52  ;;  %v773_v59 = vadd.f32 %v1523_v24, %v737_v53 }
  0xf8   : > { %v750_v60 = vadd.f32 %v1523_v24, %v714_v56  ;;  %v758_v61 = vadd.f32 %v1523_v24, %v722_v57 }
  0xf9   : > { %v797_v62 = vmax.f32 %v765_v58, 0.0  ;;  %v805_v63 = vmax.f32 %v773_v59, 0.0 }
  0xfa   : > { %v782_v0 = vmax.f32 %v750_v60, 0.0  ;;  %v790_v1 = vmax.f32 %v758_v61, 0.0 }
  0xfb   : > { %829 = vst [vmem:[%s1528_s27 + $0xa8] sm:$0xff] %v797_v62 }
  0xfc   : > { %837 = vst [vmem:[%s1528_s27 + $0xe8] sm:$0xff] %v805_v63  ;;  %v584_v2 = vpop.f32.mrf.mxu2  ;;  %v604_v3 = vpop.f32.mrf.mxu3 }
  0xfd   : > { %814 = vst [vmem:[%s1528_s27 + $0x30] sm:$0xff] %v782_v0  ;;  %v730_v4 = vmul.f32 0.999995, %v584_v2  ;;  %v738_v5 = vmul.f32 0.999995, %v604_v3  ;;  %v546_v6 = vpop.f32.mrf.mxu0  ;;  %v566_v7 = vpop.f32.mrf.mxu1 }
  0xfe   : > { %822 = vst [vmem:[%s1528_s27 + $0x70] sm:$0xff] %v790_v1  ;;  %v715_v8 = vmul.f32 0.999995, %v546_v6  ;;  %v723_v9 = vmul.f32 0.999995, %v566_v7 }
  0xff   : > { %v766_v10 = vadd.f32 %v1523_v24, %v730_v4  ;;  %v774_v11 = vadd.f32 %v1523_v24, %v738_v5 }
 0x100   : > { %v751_v12 = vadd.f32 %v1523_v24, %v715_v8  ;;  %v759_v13 = vadd.f32 %v1523_v24, %v723_v9 }
 0x101   : > { %v798_v14 = vmax.f32 %v766_v10, 0.0  ;;  %v806_v15 = vmax.f32 %v774_v11, 0.0 }
 0x102   : > { %v783_v16 = vmax.f32 %v751_v12, 0.0  ;;  %v791_v17 = vmax.f32 %v759_v13, 0.0 }
 0x103   : > { %830 = vst [vmem:[%s1528_s27 + $0xb0] sm:$0xff] %v798_v14 }
 0x104   : > { %838 = vst [vmem:[%s1528_s27 + $0xf0] sm:$0xff] %v806_v15  ;;  %v586_v18 = vpop.f32.mrf.mxu2  ;;  %v606_v19 = vpop.f32.mrf.mxu3 }
 0x105   : > { %815 = vst [vmem:[%s1528_s27 + $0x38] sm:$0xff] %v783_v16  ;;  %v731_v20 = vmul.f32 0.999995, %v586_v18  ;;  %v739_v21 = vmul.f32 0.999995, %v606_v19 }
 0x106   : > { %823 = vst [vmem:[%s1528_s27 + $0x78] sm:$0xff] %v791_v17 }
 0x107   : > { %v767_v22 = vadd.f32 %v1523_v24, %v731_v20  ;;  %v775_v23 = vadd.f32 %v1523_v24, %v739_v21 }
 0x109   : > { %v799_v25 = vmax.f32 %v767_v22, 0.0  ;;  %v807_v26 = vmax.f32 %v775_v23, 0.0 }
 0x10b   : > { %831 = vst [vmem:[%s1528_s27 + $0xb8] sm:$0xff] %v799_v25 }
 0x10c   : > { %839 = vst [vmem:[%s1528_s27 + $0xf8] sm:$0xff] %v807_v26 }
 0x10d   : > { %1300 = shalt.err (!%p1297_p12)
}
 0x10e   : > { %s1364_s6 = smov 128   ;;  %s1365_s1 = smov 8  }
 0x10f   : > { %1141 = dma.vmem_to_hbm [thread:$0]  (%p1467_p3), %s855_s15, 4096, %s857_s24, %s841_s25, %s1364_s6, %s1364_s6, %s1365_s1  }
 0x110 PF: > { %p1158_p13 = scmp.ge.s32.totalorder %s1359_s17, 2  ;;  %s871_s20 = sand.u32 1, %s1339_s12  }
 0x111   : > { %s872_s22 = scalar_lea.sflag [#allocation5], %s871_s20 }
 0x112   : > { %p1152_p0 = pnand %p1158_p13, %p1435_p6 }
 0x114   : > { %p1153_p5 = pneg %p1152_p0 }
 0x116   : > { %1334 = dma.done.wait (%p1153_p5), %s872_s22, 4096  }
 0x117   : > { %1336 = vsyncadd (%p1153_p5), %s872_s22, 4294963200  ;;  %s20_s17 = sadd.s32 1, %s1359_s17   ;;  %s1645_s12 = smov %s1343_s13 }
 0x118   : > { %p17_p7 = scmp.ge.s32.totalorder %s20_s17, 6   ;;  %s1646_s13 = smov %s1347_s14 }
 0x119   : > { %s1647_s14 = smov %s1476_s18  ;;  %s1648_s15 = smov %s1355_s16 }
 0x11a   : > { %s1649_s16 = smov %s1651_s5  ;;  %19 = sbr.rel (!%p17_p7) target bundleno = 9 (0x9), region = 93 }
 0x11f   :  { %878 = vsyncpa [#allocation4], 1 }
 0x120   :  { %880 = vsyncpa [#allocation4 + $0x1], 1 }
 0x121   :  { %881 = vsyncpa [#allocation7], 1 }
 0x122   :  { %882 = vsyncpa [#allocation5], 1 }
 0x123   :  { %884 = vsyncpa [#allocation5 + $0x1], 1 }

</bundles_post_ra>
